<compile_context>
chip_gen: v6e
topology: v6e:2x2x1
jax: 0.10.0
libtpu: 0.0.40
codegen_flags: <defaults>
</compile_context>

<pallas_src>
import math

import jax
import jax.numpy as jnp
from jax.experimental import pallas as pl
from jax.experimental.pallas import tpu as pltpu


def _round_up(x, m):
    return ((x + m - 1) // m) * m


def _qnet_kernel(x_ref, w1_ref, b1_ref, w2_ref, b2_ref, w3_ref, b3_ref, q_ref):
    """Fused 3-layer MLP: two hidden ReLU layers + linear head.

    obs streams in as f32 and is cast to the weight dtype in-kernel; accumulation,
    bias add and ReLU are f32. The head is computed against the 128-lane-padded
    w3/b3 and sliced back to action_size before the (un-padded) store.
    """
    x = x_ref[...].astype(w1_ref.dtype)                               # (TB, obs)

    h1 = jnp.dot(x, w1_ref[...], preferred_element_type=jnp.float32) + b1_ref[...]
    h1 = jnp.maximum(h1, 0.0)

    h2 = jnp.dot(h1.astype(w2_ref.dtype), w2_ref[...],
                 preferred_element_type=jnp.float32) + b2_ref[...]
    h2 = jnp.maximum(h2, 0.0)

    q = jnp.dot(h2.astype(w3_ref.dtype), w3_ref[...],
                preferred_element_type=jnp.float32) + b3_ref[...]     # (TB, act_pad)

    q_ref[...] = q[:, :q_ref.shape[1]].astype(q_ref.dtype)           # (TB, act) f32


def qnetwork_forward(obs, params, *, tile_b=4096, compute_dtype=jnp.float32):
    """Fused QNetwork forward in a single batch-tiled Pallas kernel.

    obs:    (batch, obs_size) float32
    params: dict with w1 (obs_size, 64), b1 (1, 64),
                      w2 (64, 64),       b2 (1, 64),
                      w3 (64, action_size), b3 (1, action_size)
            (weights stored transposed: (in_features, out_features))
    returns {'q': (batch, action_size) float32}
    """
    batch, obs_size = obs.shape
    hidden = params["w1"].shape[1]
    action_size = params["w3"].shape[1]
    cbytes = jnp.dtype(compute_dtype).itemsize

    # --- lane-dense head for the MXU pass only (sliced back in-kernel) ------
    act_pad = _round_up(max(action_size, 128), 128)

    w_bytes = (obs_size * hidden + hidden * hidden + hidden * act_pad) * cbytes
    bias_bytes = (2 * hidden + act_pad) * 4

    # --- batch tiling --------------------------------------------------------
    # Per-tile VMEM footprint per row (double-buffered obs/q tiles + f32 temps).
    row_bytes = (2 * obs_size * 4          # obs tile (f32, 2 buffers)
                 + 2 * action_size * 4     # q tile (f32, 2 buffers)
                 + 2 * hidden * 4          # h1 + h2 activations
                 + act_pad * 4)            # padded head output before slice
    vmem_budget = 24 << 20                 # headroom vs 32 MiB scoped / 64 MiB v7x
    tb_budget = max(8, (max(0, vmem_budget - 2 * (w_bytes + bias_bytes))
                        // row_bytes) // 8 * 8)
    tb = max(8, min(int(tile_b), tb_budget))
    tb = _round_up(min(tb, max(batch, 8)), 8)

    n_tiles_target = max(1, -(-batch // tb))
    if batch > 8:
        n_tiles_target = max(n_tiles_target, 2)   # >=2 grid steps -> both TCs on v7x
    tb = _round_up(-(-batch // n_tiles_target), 8)
    batch_pad = _round_up(batch, tb)
    n_tiles = batch_pad // tb

    # --- prepare operands (obs stays f32; cast happens in-kernel) ------------
    x = obs
    if batch_pad != batch:
        x = jnp.pad(x, ((0, batch_pad - batch), (0, 0)))

    w1 = params["w1"].astype(compute_dtype)
    w2 = params["w2"].astype(compute_dtype)
    w3 = params["w3"].astype(compute_dtype)
    b1 = params["b1"].astype(jnp.float32)
    b2 = params["b2"].astype(jnp.float32)
    b3 = params["b3"].astype(jnp.float32)
    if act_pad != action_size:
        w3 = jnp.pad(w3, ((0, 0), (0, act_pad - action_size)))
        b3 = jnp.pad(b3, ((0, 0), (0, act_pad - action_size)))

    # --- cost / vmem hints ----------------------------------------------------
    flops = 2 * batch_pad * (obs_size * hidden + hidden * hidden + hidden * act_pad)
    bytes_accessed = (batch_pad * obs_size * 4        # obs in (f32)
                      + w_bytes + bias_bytes          # params
                      + batch_pad * action_size * 4)  # q out (un-padded f32)
    cost = pl.CostEstimate(flops=int(flops), transcendentals=0,
                           bytes_accessed=int(bytes_accessed))

    vmem_bytes = (2 * (w_bytes + bias_bytes)          # resident params (2 buffers)
                  + 2 * tb * obs_size * 4             # obs tiles
                  + 2 * tb * action_size * 4          # q tiles
                  + 2 * tb * hidden * 4               # h1 / h2
                  + tb * act_pad * 4)                 # padded head output
    vmem_limit = int(min(max(2 * vmem_bytes, 4 << 20), 32 << 20))

    # --- pallas call -----------------------------------------------------------
    const2d = lambda a: pl.BlockSpec(a.shape, lambda i: (0, 0))

    q_full = pl.pallas_call(
        _qnet_kernel,
        out_shape=jax.ShapeDtypeStruct((batch_pad, action_size), jnp.float32),
        grid=(n_tiles,),
        in_specs=[
            pl.BlockSpec((tb, obs_size), lambda i: (i, 0)),   # obs: streamed per tile
            const2d(w1), const2d(b1),
            const2d(w2), const2d(b2),
            const2d(w3), const2d(b3),
        ],
        out_specs=pl.BlockSpec((tb, action_size), lambda i: (i, 0)),
        compiler_params=pltpu.CompilerParams(
            dimension_semantics=("parallel",),
            vmem_limit_bytes=vmem_limit,
        ),
        cost_estimate=cost,
    )(x, w1, b1, w2, b2, w3, b3)

    q = q_full if batch_pad == batch else q_full[:batch]
    return {"q": q}


def init_qnetwork_params(key, obs_size, action_size, hidden=64):
    """Deterministic PyTorch-style (Kaiming-uniform default nn.Linear) init.

    Weights stored transposed: (in_features, out_features).
    """
    def linear(key, fan_in, fan_out):
        kw, kb = jax.random.split(key)
        bound = 1.0 / math.sqrt(fan_in)
        w = jax.random.uniform(kw, (fan_in, fan_out), jnp.float32, -bound, bound)
        b = jax.random.uniform(kb, (1, fan_out), jnp.float32, -bound, bound)
        return w, b

    k1, k2, k3 = jax.random.split(key, 3)
    w1, b1 = linear(k1, obs_size, hidden)
    w2, b2 = linear(k2, hidden, hidden)
    w3, b3 = linear(k3, hidden, action_size)
    return {"w1": w1, "b1": b1, "w2": w2, "b2": b2, "w3": w3, "b3": b3}


def qnetwork_reference(obs, params, compute_dtype=jnp.float32):
    """Pure-JAX reference (optionally with bf16 matmul inputs)."""
    cd = compute_dtype
    h1 = jnp.maximum(jnp.dot(obs.astype(cd), params["w1"].astype(cd),
                             preferred_element_type=jnp.float32) + params["b1"], 0.0)
    h2 = jnp.maximum(jnp.dot(h1.astype(cd), params["w2"].astype(cd),
                             preferred_element_type=jnp.float32) + params["b2"], 0.0)
    q = jnp.dot(h2.astype(cd), params["w3"].astype(cd),
                preferred_element_type=jnp.float32) + params["b3"]
    return {"q": q}


if __name__ == "__main__":
    key = jax.random.PRNGKey(0)
    k_obs, k_params, k_obs2 = jax.random.split(key, 3)

    batch, obs_size, action_size = 8, 16, 4
    obs = jax.random.normal(k_obs, (batch, obs_size), dtype=jnp.float32)
    params = init_qnetwork_params(k_params, obs_size, action_size)

    ref_f32 = qnetwork_reference(obs, params)["q"]

    # Default f32 path (matches PyTorch semantics), small batch -> single tile.
    q = jax.block_until_ready(qnetwork_forward(obs, params)["q"])
    assert q.shape == (batch, action_size)
    assert jnp.allclose(q, ref_f32, atol=2e-2, rtol=2e-2), "f32 kernel mismatch vs reference"

    # Optional bf16 matmul path (obs cast happens inside the kernel).
    q_bf = jax.block_until_ready(
        qnetwork_forward(obs, params, compute_dtype=jnp.bfloat16)["q"])
    assert q_bf.shape == (batch, action_size)
    ref_bf16 = qnetwork_reference(obs, params, compute_dtype=jnp.bfloat16)["q"]
    assert jnp.allclose(q_bf, ref_bf16, atol=1e-3, rtol=1e-3), "bf16 kernel mismatch vs bf16 ref"
    assert jnp.allclose(q_bf, ref_f32, atol=5e-2, rtol=5e-2), "bf16 kernel mismatch vs f32 ref"

    # Multi-tile path (batch padding + >=2 parallel grid steps for v7x megacore).
    batch2 = 300
    obs2 = jax.random.normal(k_obs2, (batch2, obs_size), dtype=jnp.float32)
    q2 = jax.block_until_ready(qnetwork_forward(obs2, params)["q"])
    assert q2.shape == (batch2, action_size)
    ref2 = qnetwork_reference(obs2, params)["q"]
    assert jnp.allclose(q2, ref2, atol=2e-2, rtol=2e-2), "f32 kernel mismatch (tiled)"

    print("KERNEL_OK")
</pallas_src>

<mosaic_0001>
module attributes {stable_mosaic.version = 11 : i64} {
  func.func @_qnet_kernel(%arg0: i32, %arg1: memref<8x16xf32, #tpu.memory_space<vmem>>, %arg2: memref<16x64xf32, #tpu.memory_space<vmem>>, %arg3: memref<1x64xf32, #tpu.memory_space<vmem>>, %arg4: memref<64x64xf32, #tpu.memory_space<vmem>>, %arg5: memref<1x64xf32, #tpu.memory_space<vmem>>, %arg6: memref<64x128xf32, #tpu.memory_space<vmem>>, %arg7: memref<1x128xf32, #tpu.memory_space<vmem>>, %arg8: memref<8x4xf32, #tpu.memory_space<vmem>>) attributes {dimension_semantics = [#tpu.dimension_semantics<parallel>], iteration_bounds = array<i64: 1>, scalar_prefetch = 0 : i64, scratch_operands = 0 : i64, tpu.core_type = #tpu.core_type<tc>, window_params = [{transform_indices = @transform_0, window_bounds = array<i64: 8, 16>}, {pipeline_mode = #tpu.pipeline_mode<synchronous>, transform_indices = @transform_1, window_bounds = array<i64: 16, 64>}, {pipeline_mode = #tpu.pipeline_mode<synchronous>, transform_indices = @transform_2, window_bounds = array<i64: 1, 64>}, {pipeline_mode = #tpu.pipeline_mode<synchronous>, transform_indices = @transform_3, window_bounds = array<i64: 64, 64>}, {pipeline_mode = #tpu.pipeline_mode<synchronous>, transform_indices = @transform_4, window_bounds = array<i64: 1, 64>}, {pipeline_mode = #tpu.pipeline_mode<synchronous>, transform_indices = @transform_5, window_bounds = array<i64: 64, 128>}, {pipeline_mode = #tpu.pipeline_mode<synchronous>, transform_indices = @transform_6, window_bounds = array<i64: 1, 128>}, {transform_indices = @transform_7, window_bounds = array<i64: 8, 4>}]} {
    %c0 = arith.constant 0 : index
    %c0_0 = arith.constant 0 : index
    %0 = vector.load %arg1[%c0, %c0_0] : memref<8x16xf32, #tpu.memory_space<vmem>>, vector<8x16xf32>
    %c0_1 = arith.constant 0 : index
    %c0_2 = arith.constant 0 : index
    %1 = vector.load %arg2[%c0_1, %c0_2] : memref<16x64xf32, #tpu.memory_space<vmem>>, vector<16x64xf32>
    %cst = arith.constant dense<0.000000e+00> : vector<8x64xf32>
    %2 = tpu.matmul %0, %1, %cst {dimension_numbers = #tpu.dot_dimension_numbers<[1], [0], [0], [1], [0, 0, 1, 1], [], []>} : vector<8x16xf32>, vector<16x64xf32>, vector<8x64xf32> -> vector<8x64xf32>
    %c0_3 = arith.constant 0 : index
    %c0_4 = arith.constant 0 : index
    %3 = vector.load %arg3[%c0_3, %c0_4] : memref<1x64xf32, #tpu.memory_space<vmem>>, vector<1x64xf32>
    %4 = vector.broadcast %3 : vector<1x64xf32> to vector<8x64xf32>
    %5 = arith.addf %2, %4 : vector<8x64xf32>
    %cst_5 = arith.constant 0.000000e+00 : f32
    %6 = vector.broadcast %cst_5 : f32 to vector<8x64xf32>
    %7 = arith.maximumf %5, %6 : vector<8x64xf32>
    %c0_6 = arith.constant 0 : index
    %c0_7 = arith.constant 0 : index
    %8 = vector.load %arg4[%c0_6, %c0_7] : memref<64x64xf32, #tpu.memory_space<vmem>>, vector<64x64xf32>
    %cst_8 = arith.constant dense<0.000000e+00> : vector<8x64xf32>
    %9 = tpu.matmul %7, %8, %cst_8 {dimension_numbers = #tpu.dot_dimension_numbers<[1], [0], [0], [1], [0, 0, 1, 1], [], []>} : vector<8x64xf32>, vector<64x64xf32>, vector<8x64xf32> -> vector<8x64xf32>
    %c0_9 = arith.constant 0 : index
    %c0_10 = arith.constant 0 : index
    %10 = vector.load %arg5[%c0_9, %c0_10] : memref<1x64xf32, #tpu.memory_space<vmem>>, vector<1x64xf32>
    %11 = vector.broadcast %10 : vector<1x64xf32> to vector<8x64xf32>
    %12 = arith.addf %9, %11 : vector<8x64xf32>
    %cst_11 = arith.constant 0.000000e+00 : f32
    %13 = vector.broadcast %cst_11 : f32 to vector<8x64xf32>
    %14 = arith.maximumf %12, %13 : vector<8x64xf32>
    %c0_12 = arith.constant 0 : index
    %c0_13 = arith.constant 0 : index
    %15 = vector.load %arg6[%c0_12, %c0_13] : memref<64x128xf32, #tpu.memory_space<vmem>>, vector<64x128xf32>
    %cst_14 = arith.constant dense<0.000000e+00> : vector<8x128xf32>
    %16 = tpu.matmul %14, %15, %cst_14 {dimension_numbers = #tpu.dot_dimension_numbers<[1], [0], [0], [1], [0, 0, 1, 1], [], []>} : vector<8x64xf32>, vector<64x128xf32>, vector<8x128xf32> -> vector<8x128xf32>
    %c0_15 = arith.constant 0 : index
    %c0_16 = arith.constant 0 : index
    %17 = vector.load %arg7[%c0_15, %c0_16] : memref<1x128xf32, #tpu.memory_space<vmem>>, vector<1x128xf32>
    %18 = vector.broadcast %17 : vector<1x128xf32> to vector<8x128xf32>
    %19 = arith.addf %16, %18 : vector<8x128xf32>
    %20 = vector.extract_strided_slice %19 {offsets = [0, 0], sizes = [8, 4], strides = [1, 1]} : vector<8x128xf32> to vector<8x4xf32>
    %c0_17 = arith.constant 0 : index
    %c0_18 = arith.constant 0 : index
    %21 = vector.load %arg8[%c0_17, %c0_18] : memref<8x4xf32, #tpu.memory_space<vmem>>, vector<8x4xf32>
    tpu.vector_store %arg8[%c0_17, %c0_18], %20 {strides = array<i32>} : memref<8x4xf32, #tpu.memory_space<vmem>>, vector<8x4xf32>,
    return
  }
  func.func @transform_0(%arg0: i32) -> (i32, i32) {
    %c0_i32 = arith.constant 0 : i32
    %c0_i32_0 = arith.constant 0 : i32
    return %arg0, %c0_i32 : i32, i32
  }
  func.func @transform_1(%arg0: i32) -> (i32, i32) {
    %c0_i32 = arith.constant 0 : i32
    %c0_i32_0 = arith.constant 0 : i32
    %c0_i32_1 = arith.constant 0 : i32
    return %c0_i32, %c0_i32_0 : i32, i32
  }
  func.func @transform_2(%arg0: i32) -> (i32, i32) {
    %c0_i32 = arith.constant 0 : i32
    %c0_i32_0 = arith.constant 0 : i32
    %c0_i32_1 = arith.constant 0 : i32
    return %c0_i32, %c0_i32_0 : i32, i32
  }
  func.func @transform_3(%arg0: i32) -> (i32, i32) {
    %c0_i32 = arith.constant 0 : i32
    %c0_i32_0 = arith.constant 0 : i32
    %c0_i32_1 = arith.constant 0 : i32
    return %c0_i32, %c0_i32_0 : i32, i32
  }
  func.func @transform_4(%arg0: i32) -> (i32, i32) {
    %c0_i32 = arith.constant 0 : i32
    %c0_i32_0 = arith.constant 0 : i32
    %c0_i32_1 = arith.constant 0 : i32
    return %c0_i32, %c0_i32_0 : i32, i32
  }
  func.func @transform_5(%arg0: i32) -> (i32, i32) {
    %c0_i32 = arith.constant 0 : i32
    %c0_i32_0 = arith.constant 0 : i32
    %c0_i32_1 = arith.constant 0 : i32
    return %c0_i32, %c0_i32_0 : i32, i32
  }
  func.func @transform_6(%arg0: i32) -> (i32, i32) {
    %c0_i32 = arith.constant 0 : i32
    %c0_i32_0 = arith.constant 0 : i32
    %c0_i32_1 = arith.constant 0 : i32
    return %c0_i32, %c0_i32_0 : i32, i32
  }
  func.func @transform_7(%arg0: i32) -> (i32, i32) {
    %c0_i32 = arith.constant 0 : i32
    %c0_i32_0 = arith.constant 0 : i32
    return %arg0, %c0_i32 : i32, i32
  }
}

</mosaic_0001>

<bundles_post_ra>
// kernel: tpu_custom_call.1
= control target key start
LH: loop header
LB: loop body
LE: loop exit
PB: predicated region body
PF: predicated region fallthrough
CT: control target
= control target key end

     0   :  { %12 = vsyncpa [#allocation3], 0  ;;  %s624_s0 = inlined_call_operand.hbm [shape: f32[8,16], index: 0, kind: input, shape index: {}]   ;;  %s625_s1 = inlined_call_operand.hbm [shape: f32[16,64], index: 1, kind: input, shape index: {}]   ;;  %s626_s2 = inlined_call_operand.vmem [shape: f32[1,64], index: 2, kind: input, shape index: {}]   ;;  %s627_s3 = inlined_call_operand.hbm [shape: f32[64,64], index: 3, kind: input, shape index: {}]   ;;  %s628_s4 = inlined_call_operand.vmem [shape: f32[1,64], index: 4, kind: input, shape index: {}]   ;;  %s629_s5 = inlined_call_operand.hbm [shape: f32[64,128], index: 5, kind: input, shape index: {}]   ;;  %s630_s6 = inlined_call_operand.vmem [shape: f32[1,128], index: 6, kind: input, shape index: {}]   ;;  %s631_s7 = inlined_call_operand.vmem [shape: f32[8,4], index: 7, kind: output, shape index: {}]  }
   0x1   :  { %13 = vsyncpa [#allocation5], 0 }
   0x2   :  { %14 = vsyncpa [#allocation8], 0  ;;  %s517_s24 = smov [#allocation4]  }
   0x3   :  { %s30_s25 = sshll.u32 %s517_s24, 4  ;;  %s31_s25 = int_to_ptr.vmem [resolvable:$true] %s30_s25 }
   0x4   :  { %s439_s26 = scalar_lea.vmem %s31_s25, 256  ;;  %p444_p1 = scmp.lt.s32.totalorder %s31_s25, %s31_s25 }
   0x5   :  { %p440_p0 = scmp.ne.s32.totalorder %s31_s25, %s439_s26  ;;  %p445_p2 = scmp.lt.s32.totalorder %s439_s26, %s439_s26 }
   0x7   :  { %p446_p3 = por %p445_p2, %p444_p1 }
   0x9   :  { %p447_p4 = pnand %p446_p3, %p440_p0 }
   0xb   :  { %450 = shalt.err (!%p447_p4)
}
   0xc   :  { %s518_s27 = smov 128   ;;  %s519_s28 = smov 8  }
   0xd   :  { %36 = dma.hbm_to_vmem [thread:$0]  %s625_s1, 256, %s31_s25, [#allocation5], %s518_s27, %s518_s27, %s519_s28  }
   0xe   :  { %s520_s8 = smov [#allocation2]   ;;  %s521_s10 = smov [#allocation6]  }
   0xf   :  { %s21_s9 = sshll.u32 %s520_s8, 4  ;;  %s44_s11 = sshll.u32 %s521_s10, 4  ;;  %s22_s9 = int_to_ptr.vmem [resolvable:$true] %s21_s9  ;;  %s45_s11 = int_to_ptr.vmem [resolvable:$true] %s44_s11 }
  0x10   :  { %s459_s12 = scalar_lea.vmem %s22_s9, 128  ;;  %p464_p6 = scmp.lt.s32.totalorder %s22_s9, %s22_s9 }
  0x11   :  { %p460_p5 = scmp.ne.s32.totalorder %s22_s9, %s459_s12  ;;  %p465_p7 = scmp.lt.s32.totalorder %s459_s12, %s459_s12 }
  0x13   :  { %p466_p8 = por %p465_p7, %p464_p6 }
  0x15   :  { %p467_p9 = pnand %p466_p8, %p460_p5 }
  0x17   :  { %470 = shalt.err (!%p467_p9)
}
  0x18   :  { %24 = dma.hbm_to_vmem [thread:$0]  %s624_s0, 128, %s22_s9, [#allocation3]  }
  0x19   :  { %s479_s15 = scalar_lea.vmem %s45_s11, 1024  ;;  %p484_p11 = scmp.lt.s32.totalorder %s45_s11, %s45_s11 }
  0x1a   :  { %p480_p10 = scmp.ne.s32.totalorder %s45_s11, %s479_s15  ;;  %p485_p12 = scmp.lt.s32.totalorder %s479_s15, %s479_s15 }
  0x1c   :  { %p486_p13 = por %p485_p12, %p484_p11 }
  0x1e   :  { %p487_p0 = pnand %p486_p13, %p480_p10 }
  0x20   :  { %490 = shalt.err (!%p487_p0)
}
  0x21   :  { %50 = dma.hbm_to_vmem [thread:$0]  %s627_s3, 1024, %s45_s11, [#allocation5], %s518_s27, %s518_s27, %s519_s28  }
  0x22   :  { %s522_s17 = smov [#allocation7]  }
  0x23   :  { %s58_s18 = sshll.u32 %s522_s17, 4  ;;  %s59_s18 = int_to_ptr.vmem [resolvable:$true] %s58_s18 }
  0x24   :  { %s499_s19 = scalar_lea.vmem %s59_s18, 1024  ;;  %p504_p2 = scmp.lt.s32.totalorder %s59_s18, %s59_s18 }
  0x25   :  { %p500_p1 = scmp.ne.s32.totalorder %s59_s18, %s499_s19  ;;  %p505_p3 = scmp.lt.s32.totalorder %s499_s19, %s499_s19 }
  0x27   :  { %p506_p4 = por %p505_p3, %p504_p2 }
  0x29   :  { %p507_p5 = pnand %p506_p4, %p500_p1 }
  0x2b   :  { %510 = shalt.err (!%p507_p5)
}
  0x2c   :  { %64 = dma.hbm_to_vmem [thread:$0]  %s629_s5, 1024, %s59_s18, [#allocation8], %s518_s27, %s518_s27, %s519_s28  }
  0x2d   :  { %511 = dma.done.wait [#allocation3], 128  }
  0x2e   :  { %512 = vsyncadd [#allocation3], 4294967168 }
  0x2f   :  { %513 = dma.done.wait [#allocation5], 1280  }
  0x30   :  { %514 = vsyncadd [#allocation5], 4294966016 }
  0x31   :  { %515 = dma.done.wait [#allocation8], 1024  }
  0x32   :  { %516 = vsyncadd [#allocation8], 4294966272  ;;  %v523_v0 = vmov 0.0   ;;  %vm524_vm0 = vmmov 0   ;;  %v81_v1 = vld [vmem:[#allocation4 + $0x8] sm:$0xff]  ;;  %v80_v2 = vld [vmem:[#allocation4] sm:$0xff] }
  0x33   :  { %378 = vmatprep.subr.mxu0 %v523_v0  ;;  %382 = vmatprep.mubr.msk.f32.mxu0 %vm524_vm0, %v523_v0  ;;  %v79_v3 = vld [vmem:[#allocation2] sm:$0xff]  ;;  %vm89_vm1 = vcmask 130048   ;;  %v171_v4 = vld [vmem:[#allocation6 + $0x38] sm:$0xff]  ;;  %v170_v5 = vld [vmem:[#allocation6 + $0x30] sm:$0xff]  ;;  %vm179_vm2 = vcmask 523264   ;;  %vm342_vm3 = vcmask 31744  }
  0x34   :  { %385 = vmatprep.subr.mxu1 %v523_v0  ;;  %401 = vmatprep.mubr.msk.f32.mxu1 %vm524_vm0, %v523_v0  ;;  %v169_v6 = vld [vmem:[#allocation6 + $0x28] sm:$0xff]  ;;  %v168_v7 = vld [vmem:[#allocation6 + $0x20] sm:$0xff]  ;;  %v167_v8 = vld [vmem:[#allocation6 + $0x18] sm:$0xff] }
  0x35   :  { %379 = vmatpush3.msra.mxu0 %v81_v1  ;;  %386 = vmatpush3.msra.mxu1 %v171_v4  ;;  %v166_v9 = vld [vmem:[#allocation6 + $0x10] sm:$0xff]  ;;  %v165_v10 = vld [vmem:[#allocation6 + $0x8] sm:$0xff]  ;;  %v164_v11 = vld [vmem:[#allocation6] sm:$0xff] }
  0x36   :  { %380 = vmatprep.subr.mxu0 %v523_v0  ;;  %387 = vmatprep.subr.mxu1 %v523_v0  ;;  %v261_v12 = vld [vmem:[#allocation7 + $0x38] sm:$0xff]  ;;  %v260_v13 = vld [vmem:[#allocation7 + $0x30] sm:$0xff]  ;;  %v259_v14 = vld [vmem:[#allocation7 + $0x28] sm:$0xff] }
  0x37   :  { %381 = vmatpush3.msra.mxu0 %v80_v2  ;;  %388 = vmatpush3.msra.mxu1 %v170_v5  ;;  %v258_v15 = vld [vmem:[#allocation7 + $0x20] sm:$0xff]  ;;  %v257_v16 = vld [vmem:[#allocation7 + $0x18] sm:$0xff]  ;;  %v351_v17 = vld [vmem:[%s626_s2] ss:$0 sm:$0xff] }
  0x38   :  { %383 = vmatmul.mubr.msk.f32.vlgmr.msra.gmra.mxu0 %vm89_vm1, %v79_v3  ;;  %389 = vmatprep.subr.mxu1 %v523_v0  ;;  %v256_v22 = vld [vmem:[#allocation7 + $0x10] sm:$0xff]  ;;  %v255_v23 = vld [vmem:[#allocation7 + $0x8] sm:$0xff]  ;;  %v254_v24 = vld [vmem:[#allocation7] sm:$0xff] }
  0x39   :  { %404 = vmatprep.subr.mxu0 %v523_v0  ;;  %390 = vmatpush3.msra.mxu1 %v169_v6  ;;  %v353_v25 = vld [vmem:[%s628_s4] ss:$0 sm:$0xff] }
  0x3a   :  { %420 = vmatprep.mubr.msk.f32.mxu0 %vm524_vm0, %v523_v0  ;;  %391 = vmatprep.subr.mxu1 %v523_v0  ;;  %v355_v30 = vld [vmem:[%s630_s6] ss:$0 sm:$0xff] }
  0x3b   :  { %392 = vmatpush3.msra.mxu1 %v168_v7  ;;  %405 = vmatpush3.msra.mxu0 %v261_v12 }
  0x3c   :  { %393 = vmatprep.subr.mxu1 %v523_v0  ;;  %406 = vmatprep.subr.mxu0 %v523_v0 }
  0x3d   :  { %394 = vmatpush3.msra.mxu1 %v167_v8  ;;  %407 = vmatpush3.msra.mxu0 %v260_v13 }
  0x3e   :  { %395 = vmatprep.subr.mxu1 %v523_v0  ;;  %408 = vmatprep.subr.mxu0 %v523_v0 }
  0x3f   :  { %396 = vmatpush3.msra.mxu1 %v166_v9  ;;  %409 = vmatpush3.msra.mxu0 %v259_v14 }
  0x40   :  { %397 = vmatprep.subr.mxu1 %v523_v0  ;;  %410 = vmatprep.subr.mxu0 %v523_v0 }
  0x41   :  { %398 = vmatpush3.msra.mxu1 %v165_v10  ;;  %411 = vmatpush3.msra.mxu0 %v258_v15 }
  0x42   :  { %399 = vmatprep.subr.mxu1 %v523_v0  ;;  %412 = vmatprep.subr.mxu0 %v523_v0 }
  0x43   :  { %400 = vmatpush3.msra.mxu1 %v164_v11  ;;  %413 = vmatpush3.msra.mxu0 %v257_v16 }
  0x44   :  { %414 = vmatprep.subr.mxu0 %v523_v0 }
  0x45   :  { %415 = vmatpush3.msra.mxu0 %v256_v22 }
  0x46   :  { %416 = vmatprep.subr.mxu0 %v523_v0 }
  0x47   :  { %417 = vmatpush3.msra.mxu0 %v255_v23 }
  0x48   :  { %418 = vmatprep.subr.mxu0 %v523_v0 }
  0x49   :  { %419 = vmatpush3.msra.mxu0 %v254_v24 }
  0xf8   :  { %v159_v18 = vpop.f32.mrf.mxu0 }
  0xf9   :  { %v160_v19 = vadd.f32 %v351_v17, %v159_v18 }
  0xfa   :  { %v384_v20 = vpop.f32.mrf.mxu0 }
  0xfb   :  { %v163_v21 = vmax.f32 %v160_v19, 0.0 }
  0xfd   :  { %402 = vmatmul.mubr.msk.f32.vlgmr.msra.gmra.mxu1 %vm179_vm2, %v163_v21 }
 0x1bd   :  { %v249_v26 = vpop.f32.mrf.mxu1 }
 0x1be   :  { %v250_v27 = vadd.f32 %v353_v25, %v249_v26 }
 0x1bf   :  { %v403_v28 = vpop.f32.mrf.mxu1 }
 0x1c0   :  { %v253_v29 = vmax.f32 %v250_v27, 0.0 }
 0x1c2   :  { %421 = vmatmul.mubr.msk.f32.vlgmr.msra.gmra.mxu0 %vm179_vm2, %v253_v29 }
 0x282   :  { %v338_v31 = vpop.f32.mrf.mxu0 }
 0x283   :  { %v339_v32 = vadd.f32 %v355_v30, %v338_v31 }
 0x284   :  { %v422_v33 = vpop.f32.mrf.mxu0 }
 0x285   :  { %343 = vst.msk [vmem:[%s631_s7] sm:$0xff] %vm342_vm3, %v339_v32 }
 0x286   :  { %348 = vsyncpa [#allocation3], 1 }
 0x287   :  { %349 = vsyncpa [#allocation5], 1 }
 0x288   :  { %350 = vsyncpa [#allocation8], 1 }

</bundles_post_ra>
